<compile_context>
chip_gen: v6e
topology: v6e:2x2x1
jax: 0.10.0
libtpu: 0.0.40
codegen_flags: <defaults>
</compile_context>

<pallas_src>
import functools

import jax
import jax.numpy as jnp
from jax import lax
from jax.experimental import pallas as pl
from jax.experimental.pallas import tpu as pltpu


def _round_up(x, m):
    return ((x + m - 1) // m) * m


def policy_mlp_kernel(x_ref, w1_ref, b1_ref, w2_ref, b2_ref, o_ref, *,
                      num_actions, num_inputs, vpu_linear1):
    # x: (TB, F)  w1: (F, Hp)  b1: (1, Hp)  w2: (Hp, Ap)  b2: (1, Ap)  o: (TB, A)
    x = x_ref[...].astype(jnp.float32)
    w1 = w1_ref[...]
    tb = x.shape[0]
    hp = w1.shape[1]

    # ---- linear1 ----
    if vpu_linear1:
        # F is tiny: K=F matmul wastes the MXU systolic depth and pays push/pop
        # latency; do F broadcast-FMAs in the (otherwise idle) VALU slots.
        h = jnp.broadcast_to(b1_ref[...], (tb, hp)).astype(jnp.float32)
        for k in range(num_inputs):  # static, unrolled at trace time
            h = h + x[:, k:k + 1] * w1[k:k + 1, :].astype(jnp.float32)
    else:
        h = jnp.dot(x.astype(w1.dtype), w1,
                    preferred_element_type=jnp.float32) + b1_ref[...]

    # leaky_relu (negative_slope = 0.01, PyTorch default).  Padded hidden columns
    # carry zero weights/bias -> stay exactly 0 and contribute nothing below.
    h = jnp.where(h > 0, h, 0.01 * h)

    # ---- linear2 (MXU, K = Hp = 128-aligned) ----
    logits = jnp.dot(h.astype(w2_ref.dtype), w2_ref[...],
                     preferred_element_type=jnp.float32) + b2_ref[...]

    # Mask padded action columns to -inf BEFORE the row max so they get exactly
    # zero probability and do not pollute the denominator.
    col = lax.broadcasted_iota(jnp.int32, logits.shape, dimension=1)
    logits = jnp.where(col < num_actions, logits, -jnp.inf)

    # Numerically stable softmax; exact divide (denominator is a (TB,1) column).
    m = jnp.max(logits, axis=-1, keepdims=True)
    e = jnp.exp(logits - m)
    denom = jnp.sum(e, axis=-1, keepdims=True)
    probs = e / denom

    # Store only the real action columns (A-wide output, no 128-padded writeback).
    o_ref[...] = probs[:, :num_actions].astype(o_ref.dtype)


def pad_params(w1, b1, w2, b2, *, compute_dtype=jnp.float32):
    """Pad/transpose-free parameter prep; call ONCE at init time (hoisted out of
    the per-call path).  compute_dtype=jnp.bfloat16 halves weight DMA bytes and
    speeds up the MXU path at a small accuracy cost (accumulation stays f32)."""
    F, H = w1.shape
    A = w2.shape[1]
    Hp = _round_up(H, 128)
    Ap = _round_up(A, 128)
    w1p = jnp.zeros((F, Hp), compute_dtype).at[:, :H].set(w1.astype(compute_dtype))
    b1p = jnp.zeros((1, Hp), jnp.float32).at[:, :H].set(
        b1.reshape(1, H).astype(jnp.float32))
    w2p = jnp.zeros((Hp, Ap), compute_dtype).at[:H, :A].set(w2.astype(compute_dtype))
    b2p = jnp.zeros((1, Ap), jnp.float32).at[:, :A].set(
        b2.reshape(1, A).astype(jnp.float32))
    return dict(w1=w1p, b1=b1p, w2=w2p, b2=b2p,
                num_inputs=F, num_actions=A)


def policy_forward(state, params, *, block_batch=512):
    """state: (B, F) float; params: output of pad_params.  Returns (B, A) probs."""
    state = state.astype(jnp.float32)
    B, F = state.shape
    assert F == params["num_inputs"]
    A = params["num_actions"]
    w1p, b1p, w2p, b2p = params["w1"], params["b1"], params["w2"], params["b2"]
    Hp, Ap = w2p.shape

    # Pad the batch to a multiple of 8 sublanes only (at most 7 extra rows);
    # the grid uses pl.cdiv so no rounding up to the block size is needed.
    Bp = _round_up(B, 8)
    xin = state if Bp == B else jnp.zeros((Bp, F), jnp.float32).at[:B, :].set(state)

    # Batch tile: multiple of 8; capped so the grid has >= 2 steps whenever the
    # batch allows it, so the "parallel" axis feeds both v7x TensorCores.
    TB = min(_round_up(block_batch, 8), max(8, _round_up(pl.cdiv(Bp, 2), 8)))
    grid = (pl.cdiv(Bp, TB),)

    kernel = functools.partial(
        policy_mlp_kernel,
        num_actions=A, num_inputs=F, vpu_linear1=(F <= 8))

    # Resident weights are double-buffered by the pipeliner even with constant
    # index_maps; raise the scoped VMEM limit only when they are large (keeps
    # headroom on v7x's 64 MiB VMEM / 32 MiB scoped default).
    weight_bytes = (w1p.size * w1p.dtype.itemsize + w2p.size * w2p.dtype.itemsize)
    vmem_limit = None
    if 2 * weight_bytes > 24 * 1024 * 1024:
        vmem_limit = min(100 * 1024 * 1024, 4 * weight_bytes + 16 * 1024 * 1024)

    flops = 2 * Bp * (F * Hp + Hp * Ap)
    transcendentals = Bp * Ap
    bytes_accessed = (xin.size * 4 + weight_bytes
                      + b1p.size * 4 + b2p.size * 4 + Bp * A * 4)

    out = pl.pallas_call(
        kernel,
        out_shape=jax.ShapeDtypeStruct((Bp, A), jnp.float32),
        grid=grid,
        in_specs=[
            pl.BlockSpec((TB, F), lambda i: (i, 0)),    # state tile (pipelined)
            pl.BlockSpec((F, Hp), lambda i: (0, 0)),    # w1 (VMEM-resident)
            pl.BlockSpec((1, Hp), lambda i: (0, 0)),    # b1 (VMEM-resident)
            pl.BlockSpec((Hp, Ap), lambda i: (0, 0)),   # w2 (VMEM-resident)
            pl.BlockSpec((1, Ap), lambda i: (0, 0)),    # b2 (VMEM-resident)
        ],
        out_specs=pl.BlockSpec((TB, A), lambda i: (i, 0)),
        compiler_params=pltpu.CompilerParams(
            dimension_semantics=("parallel",),
            vmem_limit_bytes=vmem_limit),
        cost_estimate=pl.CostEstimate(
            flops=flops, transcendentals=transcendentals,
            bytes_accessed=bytes_accessed),
    )(xin, w1p, b1p, w2p, b2p)

    return out if Bp == B else out[:B]


def init_params(key, num_inputs, num_actions, hidden_size):
    # Deterministic init mimicking nn.Linear: U(-1/sqrt(fan_in), 1/sqrt(fan_in)).
    k1, k2, k3, k4 = jax.random.split(key, 4)
    bound1 = 1.0 / jnp.sqrt(num_inputs)
    bound2 = 1.0 / jnp.sqrt(hidden_size)
    w1 = jax.random.uniform(k1, (num_inputs, hidden_size), jnp.float32, -bound1, bound1)
    b1 = jax.random.uniform(k2, (1, hidden_size), jnp.float32, -bound1, bound1)
    w2 = jax.random.uniform(k3, (hidden_size, num_actions), jnp.float32, -bound2, bound2)
    b2 = jax.random.uniform(k4, (1, num_actions), jnp.float32, -bound2, bound2)
    return w1, b1, w2, b2


if __name__ == "__main__":
    num_inputs, num_actions, hidden_size = 4, 2, 32
    batch = 2

    key = jax.random.PRNGKey(0)
    k_state, k_params = jax.random.split(key)
    state = jax.random.normal(k_state, (batch, num_inputs), jnp.float32)
    w1, b1, w2, b2 = init_params(k_params, num_inputs, num_actions, hidden_size)

    # Pad/prepare weights once at init time (hoisted out of the per-call path).
    params = pad_params(w1, b1, w2, b2)

    probs = policy_forward(state, params)
    probs = jax.block_until_ready(probs)

    # Pure-JAX f32 reference.
    h_ref = state @ w1 + b1
    h_ref = jnp.where(h_ref > 0, h_ref, 0.01 * h_ref)
    logits_ref = h_ref @ w2 + b2
    probs_ref = jax.nn.softmax(logits_ref, axis=-1)

    assert probs.shape == (batch, num_actions)
    assert jnp.allclose(probs, probs_ref, atol=1e-5, rtol=1e-5), "mismatch vs reference"
    assert jnp.allclose(jnp.sum(probs, axis=-1), 1.0, atol=1e-5)

    # TODO(synk): nn.Dropout / Adam / MSELoss / act() sampling are not part of
    # forward() and are intentionally not implemented in the kernel.

    print("KERNEL_OK")
</pallas_src>

<mosaic_0001>
module attributes {stable_mosaic.version = 11 : i64} {
  func.func @policy_mlp_kernel(%arg0: i32, %arg1: memref<8x4xf32, #tpu.memory_space<vmem>>, %arg2: memref<4x128xf32, #tpu.memory_space<vmem>>, %arg3: memref<1x128xf32, #tpu.memory_space<vmem>>, %arg4: memref<128x128xf32, #tpu.memory_space<vmem>>, %arg5: memref<1x128xf32, #tpu.memory_space<vmem>>, %arg6: memref<8x2xf32, #tpu.memory_space<vmem>>) attributes {dimension_semantics = [#tpu.dimension_semantics<parallel>], iteration_bounds = array<i64: 1>, scalar_prefetch = 0 : i64, scratch_operands = 0 : i64, tpu.core_type = #tpu.core_type<tc>, window_params = [{transform_indices = @transform_0, window_bounds = array<i64: 8, 4>}, {pipeline_mode = #tpu.pipeline_mode<synchronous>, transform_indices = @transform_1, window_bounds = array<i64: 4, 128>}, {pipeline_mode = #tpu.pipeline_mode<synchronous>, transform_indices = @transform_2, window_bounds = array<i64: 1, 128>}, {pipeline_mode = #tpu.pipeline_mode<synchronous>, transform_indices = @transform_3, window_bounds = array<i64: 128, 128>}, {pipeline_mode = #tpu.pipeline_mode<synchronous>, transform_indices = @transform_4, window_bounds = array<i64: 1, 128>}, {transform_indices = @transform_5, window_bounds = array<i64: 8, 2>}]} {
    %c0 = arith.constant 0 : index
    %c0_0 = arith.constant 0 : index
    %0 = vector.load %arg1[%c0, %c0_0] : memref<8x4xf32, #tpu.memory_space<vmem>>, vector<8x4xf32>
    %c0_1 = arith.constant 0 : index
    %c0_2 = arith.constant 0 : index
    %1 = vector.load %arg2[%c0_1, %c0_2] : memref<4x128xf32, #tpu.memory_space<vmem>>, vector<4x128xf32>
    %c0_3 = arith.constant 0 : index
    %c0_4 = arith.constant 0 : index
    %2 = vector.load %arg3[%c0_3, %c0_4] : memref<1x128xf32, #tpu.memory_space<vmem>>, vector<1x128xf32>
    %3 = vector.shape_cast %2 : vector<1x128xf32> to vector<1x128xf32>
    %4 = vector.broadcast %3 : vector<1x128xf32> to vector<8x128xf32>
    %5 = vector.extract_strided_slice %0 {offsets = [0, 0], sizes = [8, 1], strides = [1, 1]} : vector<8x4xf32> to vector<8x1xf32>
    %6 = vector.extract_strided_slice %1 {offsets = [0, 0], sizes = [1, 128], strides = [1, 1]} : vector<4x128xf32> to vector<1x128xf32>
    %7 = vector.broadcast %5 : vector<8x1xf32> to vector<8x128xf32>
    %8 = vector.broadcast %6 : vector<1x128xf32> to vector<8x128xf32>
    %9 = arith.mulf %7, %8 : vector<8x128xf32>
    %10 = arith.addf %4, %9 : vector<8x128xf32>
    %11 = vector.extract_strided_slice %0 {offsets = [0, 1], sizes = [8, 1], strides = [1, 1]} : vector<8x4xf32> to vector<8x1xf32>
    %12 = vector.extract_strided_slice %1 {offsets = [1, 0], sizes = [1, 128], strides = [1, 1]} : vector<4x128xf32> to vector<1x128xf32>
    %13 = vector.broadcast %11 : vector<8x1xf32> to vector<8x128xf32>
    %14 = vector.broadcast %12 : vector<1x128xf32> to vector<8x128xf32>
    %15 = arith.mulf %13, %14 : vector<8x128xf32>
    %16 = arith.addf %10, %15 : vector<8x128xf32>
    %17 = vector.extract_strided_slice %0 {offsets = [0, 2], sizes = [8, 1], strides = [1, 1]} : vector<8x4xf32> to vector<8x1xf32>
    %18 = vector.extract_strided_slice %1 {offsets = [2, 0], sizes = [1, 128], strides = [1, 1]} : vector<4x128xf32> to vector<1x128xf32>
    %19 = vector.broadcast %17 : vector<8x1xf32> to vector<8x128xf32>
    %20 = vector.broadcast %18 : vector<1x128xf32> to vector<8x128xf32>
    %21 = arith.mulf %19, %20 : vector<8x128xf32>
    %22 = arith.addf %16, %21 : vector<8x128xf32>
    %23 = vector.extract_strided_slice %0 {offsets = [0, 3], sizes = [8, 1], strides = [1, 1]} : vector<8x4xf32> to vector<8x1xf32>
    %24 = vector.extract_strided_slice %1 {offsets = [3, 0], sizes = [1, 128], strides = [1, 1]} : vector<4x128xf32> to vector<1x128xf32>
    %25 = vector.broadcast %23 : vector<8x1xf32> to vector<8x128xf32>
    %26 = vector.broadcast %24 : vector<1x128xf32> to vector<8x128xf32>
    %27 = arith.mulf %25, %26 : vector<8x128xf32>
    %28 = arith.addf %22, %27 : vector<8x128xf32>
    %cst = arith.constant 0.000000e+00 : f32
    %29 = vector.broadcast %cst : f32 to vector<8x128xf32>
    %30 = arith.cmpf ogt, %28, %29 : vector<8x128xf32>
    %cst_5 = arith.constant 0.00999999977 : f32
    %31 = vector.broadcast %cst_5 : f32 to vector<8x128xf32>
    %32 = arith.mulf %31, %28 : vector<8x128xf32>
    %33 = arith.select %30, %28, %32 : vector<8x128xi1>, vector<8x128xf32>
    %c0_6 = arith.constant 0 : index
    %c0_7 = arith.constant 0 : index
    %34 = vector.load %arg4[%c0_6, %c0_7] : memref<128x128xf32, #tpu.memory_space<vmem>>, vector<128x128xf32>
    %cst_8 = arith.constant dense<0.000000e+00> : vector<8x128xf32>
    %35 = tpu.matmul %33, %34, %cst_8 {dimension_numbers = #tpu.dot_dimension_numbers<[1], [0], [0], [1], [0, 0, 1, 1], [], []>} : vector<8x128xf32>, vector<128x128xf32>, vector<8x128xf32> -> vector<8x128xf32>
    %c0_9 = arith.constant 0 : index
    %c0_10 = arith.constant 0 : index
    %36 = vector.load %arg5[%c0_9, %c0_10] : memref<1x128xf32, #tpu.memory_space<vmem>>, vector<1x128xf32>
    %37 = vector.broadcast %36 : vector<1x128xf32> to vector<8x128xf32>
    %38 = arith.addf %35, %37 : vector<8x128xf32>
    %39 = tpu.iota {dimensions = array<i32: 1>} : vector<8x128xi32>
    %c2_i32 = arith.constant 2 : i32
    %40 = vector.broadcast %c2_i32 : i32 to vector<8x128xi32>
    %41 = arith.cmpi slt, %39, %40 : vector<8x128xi32>
    %cst_11 = arith.constant 0xFF800000 : f32
    %42 = vector.broadcast %cst_11 : f32 to vector<8x128xf32>
    %43 = arith.select %41, %38, %42 : vector<8x128xi1>, vector<8x128xf32>
    %cst_12 = arith.constant dense<0xFF800000> : vector<8xf32>
    %44 = vector.multi_reduction <maximumf>, %43, %cst_12 [1] : vector<8x128xf32> to vector<8xf32>
    %45 = vector.shape_cast %44 : vector<8xf32> to vector<8x1xf32>
    %46 = vector.broadcast %45 : vector<8x1xf32> to vector<8x128xf32>
    %47 = arith.subf %43, %46 : vector<8x128xf32>
    %48 = math.exp %47 : vector<8x128xf32>
    %cst_13 = arith.constant dense<0.000000e+00> : vector<8xf32>
    %49 = vector.multi_reduction <add>, %48, %cst_13 [1] : vector<8x128xf32> to vector<8xf32>
    %50 = vector.shape_cast %49 : vector<8xf32> to vector<8x1xf32>
    %51 = vector.broadcast %50 : vector<8x1xf32> to vector<8x128xf32>
    %52 = arith.divf %48, %51 : vector<8x128xf32>
    %53 = vector.extract_strided_slice %52 {offsets = [0, 0], sizes = [8, 2], strides = [1, 1]} : vector<8x128xf32> to vector<8x2xf32>
    %c0_14 = arith.constant 0 : index
    %c0_15 = arith.constant 0 : index
    %54 = vector.load %arg6[%c0_14, %c0_15] : memref<8x2xf32, #tpu.memory_space<vmem>>, vector<8x2xf32>
    tpu.vector_store %arg6[%c0_14, %c0_15], %53 {strides = array<i32>} : memref<8x2xf32, #tpu.memory_space<vmem>>, vector<8x2xf32>,
    return
  }
  func.func @transform_0(%arg0: i32) -> (i32, i32) {
    %c0_i32 = arith.constant 0 : i32
    %c0_i32_0 = arith.constant 0 : i32
    return %arg0, %c0_i32 : i32, i32
  }
  func.func @transform_1(%arg0: i32) -> (i32, i32) {
    %c0_i32 = arith.constant 0 : i32
    %c0_i32_0 = arith.constant 0 : i32
    %c0_i32_1 = arith.constant 0 : i32
    return %c0_i32, %c0_i32_0 : i32, i32
  }
  func.func @transform_2(%arg0: i32) -> (i32, i32) {
    %c0_i32 = arith.constant 0 : i32
    %c0_i32_0 = arith.constant 0 : i32
    %c0_i32_1 = arith.constant 0 : i32
    return %c0_i32, %c0_i32_0 : i32, i32
  }
  func.func @transform_3(%arg0: i32) -> (i32, i32) {
    %c0_i32 = arith.constant 0 : i32
    %c0_i32_0 = arith.constant 0 : i32
    %c0_i32_1 = arith.constant 0 : i32
    return %c0_i32, %c0_i32_0 : i32, i32
  }
  func.func @transform_4(%arg0: i32) -> (i32, i32) {
    %c0_i32 = arith.constant 0 : i32
    %c0_i32_0 = arith.constant 0 : i32
    %c0_i32_1 = arith.constant 0 : i32
    return %c0_i32, %c0_i32_0 : i32, i32
  }
  func.func @transform_5(%arg0: i32) -> (i32, i32) {
    %c0_i32 = arith.constant 0 : i32
    %c0_i32_0 = arith.constant 0 : i32
    return %arg0, %c0_i32 : i32, i32
  }
}

</mosaic_0001>

<bundles_post_ra>
// kernel: tpu_custom_call.1
= control target key start
LH: loop header
LB: loop body
LE: loop exit
PB: predicated region body
PF: predicated region fallthrough
CT: control target
= control target key end

     0   :  { %10 = vsyncpa [#allocation3], 0  ;;  %s294_s18 = smov [#allocation2]   ;;  %s351_s0 = inlined_call_operand.vmem [shape: f32[8,4], index: 0, kind: input, shape index: {}]   ;;  %s352_s1 = inlined_call_operand.vmem [shape: f32[4,128], index: 1, kind: input, shape index: {}]   ;;  %s353_s2 = inlined_call_operand.vmem [shape: f32[1,128], index: 2, kind: input, shape index: {}]   ;;  %s354_s3 = inlined_call_operand.hbm [shape: f32[128,128], index: 3, kind: input, shape index: {}]   ;;  %s355_s4 = inlined_call_operand.vmem [shape: f32[1,128], index: 4, kind: input, shape index: {}]   ;;  %s356_s5 = inlined_call_operand.vmem [shape: f32[8,2], index: 5, kind: output, shape index: {}]  }
   0x1   :  { %s22_s19 = sshll.u32 %s294_s18, 4  ;;  %s23_s19 = int_to_ptr.vmem [resolvable:$true] %s22_s19 }
   0x2   :  { %s280_s20 = scalar_lea.vmem %s23_s19, 2048  ;;  %p285_p1 = scmp.lt.s32.totalorder %s23_s19, %s23_s19 }
   0x3   :  { %p281_p0 = scmp.ne.s32.totalorder %s23_s19, %s280_s20  ;;  %p286_p2 = scmp.lt.s32.totalorder %s280_s20, %s280_s20 }
   0x5   :  { %p287_p3 = por %p286_p2, %p285_p1 }
   0x7   :  { %p288_p4 = pnand %p287_p3, %p281_p0 }
   0x9   :  { %291 = shalt.err (!%p288_p4)
}
   0xa   :  { %s295_s21 = smov 128   ;;  %s296_s22 = smov 8  }
   0xb   :  { %28 = dma.hbm_to_vmem [thread:$0]  %s354_s3, 2048, %s23_s19, [#allocation3], %s295_s21, %s295_s21, %s296_s22  }
   0xc   :  { %292 = dma.done.wait [#allocation3], 2048  }
   0xd   :  { %293 = vsyncadd [#allocation3], 4294965248  ;;  %v297_v0 = vmov 0   ;;  %v298_v1 = vmov 2   ;;  %v299_v2 = vmov 0.0   ;;  %v34_v3 = vld [vmem:[%s351_s0] sm:$0xff]  ;;  %v48_v22 = vlaneseq }
   0xe   :  { %263 = vset.pattern.permute.xlu0 %v297_v0  ;;  %265 = vset.pattern.permute.xlu1 %v298_v1  ;;  %v102_v4 = vld [vmem:[#allocation2 + $0x78] sm:$0xff]  ;;  %v101_v5 = vld [vmem:[#allocation2 + $0x70] sm:$0xff]  ;;  %v300_v6 = vmov 1   ;;  %v301_v7 = vmov 3   ;;  %v100_v8 = vld [vmem:[#allocation2 + $0x68] sm:$0xff]  ;;  %vm302_vm0 = vmmov 0  }
   0xf   :  { %219 = vmatprep.subr.mxu0 %v299_v2  ;;  %45 = vperm.xlu0 %263, %v34_v3   ;;  %v99_v9 = vld [vmem:[#allocation2 + $0x60] sm:$0xff]  ;;  %v98_v10 = vld [vmem:[#allocation2 + $0x58] sm:$0xff]  ;;  %v97_v11 = vld [vmem:[#allocation2 + $0x50] sm:$0xff]  ;;  %v49_v23 = vshrl.u32 %v48_v22, 7  ;;  %v181_v48 = vand.u32 127, %v48_v22  ;;  %vm193_vm3 = vcmask 15360  }
  0x10   :  { %65 = vperm.xlu1 %265, %v34_v3   ;;  %220 = vmatpush3.msra.mxu0 %v102_v4  ;;  %v96_v12 = vld [vmem:[#allocation2 + $0x48] sm:$0xff]  ;;  %v95_v13 = vld [vmem:[#allocation2 + $0x40] sm:$0xff]  ;;  %v94_v14 = vld [vmem:[#allocation2 + $0x38] sm:$0xff] }
  0x11   :  { %221 = vmatprep.subr.mxu0 %v299_v2  ;;  %251 = vmatprep.mubr.msk.f32.mxu0 %vm302_vm0, %v299_v2  ;;  %v93_v15 = vld [vmem:[#allocation2 + $0x30] sm:$0xff]  ;;  %v92_v16 = vld [vmem:[#allocation2 + $0x28] sm:$0xff]  ;;  %v91_v17 = vld [vmem:[#allocation2 + $0x20] sm:$0xff]  ;;  %v50_v24 = vsub.s32 0, %v49_v23  ;;  %v60_v27 = vsub.s32 1, %v49_v23  ;;  %v70_v29 = vsub.s32 2, %v49_v23 }
  0x12   :  { %222 = vmatpush3.msra.mxu0 %v101_v5  ;;  %v90_v18 = vld [vmem:[#allocation2 + $0x18] sm:$0xff]  ;;  %v89_v19 = vld [vmem:[#allocation2 + $0x10] sm:$0xff]  ;;  %v88_v20 = vld [vmem:[#allocation2 + $0x8] sm:$0xff]  ;;  %v80_v31 = vsub.s32 3, %v49_v23  ;;  %vm182_vm2 = vcmp.lt.s32.totalorder %v181_v48, 2 }
  0x13   :  { %264 = vset.pattern.permute.xlu0 %v300_v6  ;;  %223 = vmatprep.subr.mxu0 %v299_v2  ;;  %v87_v21 = vld [vmem:[#allocation2] sm:$0xff] }
  0x14   :  { %266 = vset.pattern.permute.xlu1 %v301_v7  ;;  %55 = vperm.xlu0 %264, %v34_v3   ;;  %v35_v25 = vld [vmem:[%s352_s1] sm:$0xf] }
  0x15   :  { %75 = vperm.xlu1 %266, %v34_v3   ;;  %224 = vmatpush3.msra.mxu0 %v100_v8  ;;  %v51_v26 = vrot.slane %v35_v25, %v50_v24  ;;  %v61_v33 = vrot.slane %v35_v25, %v60_v27  ;;  %v200_v34 = vld [vmem:[%s353_s2] ss:$0 sm:$0xff]  ;;  %v71_v35 = vrot.slane %v35_v25, %v70_v29 }
  0x16   :  { %225 = vmatprep.subr.mxu0 %v299_v2  ;;  %v81_v36 = vrot.slane %v35_v25, %v80_v31  ;;  %v201_v49 = vld [vmem:[%s355_s4] ss:$0 sm:$0xff] }
  0x17   :  { %226 = vmatpush3.msra.mxu0 %v99_v9 }
  0x18   :  { %267 = vset.pattern.permute.xlu0 %v301_v7  ;;  %227 = vmatprep.subr.mxu0 %v299_v2 }
  0x19   :  { %228 = vmatpush3.msra.mxu0 %v98_v10 }
  0x1a   :  { %229 = vmatprep.subr.mxu0 %v299_v2 }
  0x1b   :  { %230 = vmatpush3.msra.mxu0 %v97_v11 }
  0x1c   :  { %231 = vmatprep.subr.mxu0 %v299_v2 }
  0x1d   :  { %232 = vmatpush3.msra.mxu0 %v96_v12 }
  0x1e   :  { %233 = vmatprep.subr.mxu0 %v299_v2 }
  0x1f   :  { %234 = vmatpush3.msra.mxu0 %v95_v13 }
  0x20   :  { %235 = vmatprep.subr.mxu0 %v299_v2 }
  0x21   :  { %236 = vmatpush3.msra.mxu0 %v94_v14 }
  0x22   :  { %237 = vmatprep.subr.mxu0 %v299_v2 }
  0x23   :  { %238 = vmatpush3.msra.mxu0 %v93_v15 }
  0x24   :  { %239 = vmatprep.subr.mxu0 %v299_v2 }
  0x25   :  { %240 = vmatpush3.msra.mxu0 %v92_v16 }
  0x26   :  { %241 = vmatprep.subr.mxu0 %v299_v2 }
  0x27   :  { %242 = vmatpush3.msra.mxu0 %v91_v17 }
  0x28   :  { %243 = vmatprep.subr.mxu0 %v299_v2 }
  0x29   :  { %244 = vmatpush3.msra.mxu0 %v90_v18 }
  0x2a   :  { %245 = vmatprep.subr.mxu0 %v299_v2 }
  0x2b   :  { %246 = vmatpush3.msra.mxu0 %v89_v19 }
  0x2c   :  { %247 = vmatprep.subr.mxu0 %v299_v2 }
  0x2d   :  { %248 = vmatpush3.msra.mxu0 %v88_v20 }
  0x2e   :  { %249 = vmatprep.subr.mxu0 %v299_v2 }
  0x2f   :  { %250 = vmatpush3.msra.mxu0 %v87_v21 }
  0x8a   :  { %v46_v28 = vpop.permute.xlu0 %45 }
  0x8b   :  { %v66_v30 = vpop.permute.xlu1 %65  ;;  %v52_v32 = vmul.f32 %v51_v26, %v46_v28 }
  0x8c   :  { %v72_v41 = vmul.f32 %v71_v35, %v66_v30 }
  0x8d   :  { %v53_v39 = vadd.f32 %v200_v34, %v52_v32 }
  0x8f   :  { %v56_v37 = vpop.permute.xlu0 %55 }
  0x90   :  { %v76_v38 = vpop.permute.xlu1 %75  ;;  %v62_v40 = vmul.f32 %v61_v33, %v56_v37 }
  0x91   :  { %v82_v43 = vmul.f32 %v81_v36, %v76_v38 }
  0x92   :  { %v63_v42 = vadd.f32 %v62_v40, %v53_v39 }
  0x94   :  { %v73_v44 = vadd.f32 %v72_v41, %v63_v42 }
  0x96   :  { %v83_v45 = vadd.f32 %v82_v43, %v73_v44 }
  0x98   :  { %vm84_vm1 = vcmp.gt.f32.partialorder %v83_v45, 0.0  ;;  %v85_v46 = vmul.f32 0.01, %v83_v45 }
  0x9a   :  { %v86_v47 = vsel %vm84_vm1, %v83_v45, %v85_v46 }
  0x9b   :  { %252 = vmatmul.mubr.f32.vlgmr.msra.gmra.mxu0 %v86_v47 }
 0x15b   :  { %v176_v50 = vpop.f32.mrf.mxu0 }
 0x15c   :  { %v177_v51 = vadd.f32 %v201_v49, %v176_v50 }
 0x15d   :  { %v253_v52 = vpop.f32.mrf.mxu0 }
 0x15e   :  { %v183_v53 = vsel %vm182_vm2, %v177_v51, -inf }
 0x15f   :  { %184 = vmax.xlane.f32.xlu1 %v183_v53 }
 0x1e8   :  { %v185_v54 = vpop.xlane.xlu1 %184 }
 0x1e9   :  { %v186_v55 = vsub.f32 %v183_v53, %v185_v54 }
 0x1eb   :  { %v187_v56 = vmul.f32 1.442695, %v186_v55 }
 0x1ed   :  { %268 = vpow2.f32 %v187_v56 }
 0x1fa   :  { %v269_v57 = vpop.eup %268 }
 0x1fb   :  { %189 = vadd.xlane.f32.xlu0 %v269_v57 }
 0x284   :  { %v190_v58 = vpop.xlane.xlu0 %189 }
 0x285   :  { %270 = vrcp.f32 %v190_v58 }
 0x292   :  { %v271_v59 = vpop.eup %270 }
 0x293   :  { %v192_v60 = vmul.f32 %v271_v59, %v269_v57 }
 0x295   :  { %194 = vst.msk [vmem:[%s356_s5] sm:$0xff] %vm193_vm3, %v192_v60 }
 0x296   :  { %199 = vsyncpa [#allocation3], 1 }

</bundles_post_ra>
